<compile_context>
chip_gen: v6e
topology: v6e:2x2x1
jax: 0.10.0
libtpu: 0.0.40
codegen_flags: <defaults>
</compile_context>

<pallas_src>
import functools

import jax
import jax.numpy as jnp
from jax.experimental import pallas as pl
from jax.experimental.pallas import tpu as pltpu


def sgcn_kernel(x_ref, a_ref, w_ref, b_ref, o_ref, hops_ref, *, gdep, alpha, N, Lt):
    # x_ref   : (1, C, N*Lt) or (1, C, N, Lt)  -- one batch element, one seq tile
    # a_ref   : (N, N)   (1 - alpha) * row_normalize(adj + I)   [hoisted to the wrapper]
    # w_ref   : (C_out, (gdep+1)*C)            -- 1x1-conv weight
    # b_ref   : (C_out, 1)                     -- 1x1-conv bias
    # o_ref   : (1, C_out, N*Lt) or (1, C_out, N, Lt)
    # hops_ref: (N, (gdep+1)*C*Lt) VMEM scratch holding every hop, node-major
    C = x_ref.shape[1]
    C_out = w_ref.shape[0]
    CL = C * Lt

    x = x_ref[...].astype(jnp.float32).reshape(C, N, Lt)
    a = a_ref[...].astype(jnp.float32)

    # Single relayout to node-major on the VMEM-resident tile (the only transpose that
    # sits on the serial hop chain). Per-node lane fold order is (c, l).
    xn = jnp.transpose(x, (1, 0, 2)).reshape(N, CL)                    # (N, C*Lt)
    ax = alpha * xn                                                    # hoisted, reused per hop

    h = xn
    hops_ref[:, 0:CL] = h                                              # hop-0 column block
    for k in range(1, gdep + 1):
        # graph propagation: one (N,N) x (N, C*Lt) MXU matmul covering all channels/lanes.
        h = ax + jnp.dot(a, h, preferred_element_type=jnp.float32)
        hops_ref[:, k * CL:(k + 1) * CL] = h                           # contiguous store, no transpose

    # Stacked 1x1 conv: ONE matmul over all hops (K = (gdep+1)*C) instead of a tiny matmul
    # per hop.  hops_ref[v, (k*C + c)*Lt + l] == h_k[c, v, l]; channel-major relayout once.
    Ct = (gdep + 1) * C
    h_cm = jnp.transpose(hops_ref[...].reshape(N, Ct, Lt), (1, 0, 2)).reshape(Ct, N * Lt)
    w = w_ref[...].astype(jnp.float32)
    y = jnp.dot(w, h_cm, preferred_element_type=jnp.float32)          # (C_out, N*Lt)
    y = y + b_ref[...].astype(jnp.float32)
    o_ref[...] = y.reshape(o_ref.shape).astype(o_ref.dtype)


def muti_level_wave_gcn(wave_feature, adj, conv_w, conv_b, *, gdep=1, alpha=0.05,
                        seq_block=None):
    """wave_feature: (B, C, N, L); adj: (N, N); conv_w: (C_out, (gdep+1)*C); conv_b: (C_out,)."""
    B, C, N, L = wave_feature.shape
    C_out, C_tot = conv_w.shape
    assert C_tot == (gdep + 1) * C

    # Seq tile: full L for short sequences; for long (128-multiple) L, pick a 128-multiple
    # divisor so loads/stores stay unmasked full-lane vregs and per-step VMEM stays bounded.
    if seq_block is None:
        seq_block = L
        if L > 1024 and L % 128 == 0:
            for cand in range(1024, 0, -128):
                if L % cand == 0:
                    seq_block = cand
                    break
    Lt = int(seq_block)
    assert L % Lt == 0
    seq_tiles = L // Lt

    # Grid-invariant preprocessing hoisted out of the kernel:
    #   a_s = (1 - alpha) * row_normalize(adj + I)
    # (Same divide as the reference; a zero row-sum would be inf/nan there too.)
    a = adj.astype(jnp.float32) + jnp.eye(N, dtype=jnp.float32)
    a = (1.0 - float(alpha)) * (a / jnp.sum(a, axis=1, keepdims=True))

    bias = conv_b.reshape(C_out, 1)

    # Explicit VMEM budget: double-buffered in/out blocks + resident a/w/bias + hop-stack
    # scratch, with headroom for in-kernel relayout temporaries.  Capped well under v7x's
    # 64 MiB physical VMEM; floor keeps small problems away from v5e's 16 MiB scoped default.
    blk_bytes = 4 * (C * N * Lt + C_out * N * Lt)
    fixed_bytes = 4 * (N * N + C_out * C_tot + C_out)
    scratch_bytes = 4 * N * C_tot * Lt
    vmem_limit = int(min(32 << 20, max(4 << 20, 8 * (2 * blk_bytes + fixed_bytes + scratch_bytes))))

    kernel = functools.partial(sgcn_kernel, gdep=int(gdep), alpha=float(alpha), N=N, Lt=Lt)

    if seq_tiles == 1:
        # (N, L) folded into one lane-dense last dim; pure reshape, no HBM data movement.
        x_in = wave_feature.reshape(B, C, N * L)
        grid = (B,)
        dims = ("parallel",)
        x_spec = pl.BlockSpec((1, C, N * L), lambda b: (b, 0, 0))
        o_spec = pl.BlockSpec((1, C_out, N * L), lambda b: (b, 0, 0))
        out_sds = jax.ShapeDtypeStruct((B, C_out, N * L), wave_feature.dtype)
        fix = lambda b: (0, 0)
    else:
        # Long sequences: additionally tile L (Lt is a 128-multiple divisor of L).
        x_in = wave_feature
        grid = (B, seq_tiles)
        dims = ("parallel", "parallel")
        x_spec = pl.BlockSpec((1, C, N, Lt), lambda b, t: (b, 0, 0, t))
        o_spec = pl.BlockSpec((1, C_out, N, Lt), lambda b, t: (b, 0, 0, t))
        out_sds = jax.ShapeDtypeStruct((B, C_out, N, L), wave_feature.dtype)
        fix = lambda b, t: (0, 0)

    out = pl.pallas_call(
        kernel,
        out_shape=out_sds,
        grid=grid,
        in_specs=[
            x_spec,
            pl.BlockSpec((N, N), fix),            # a_s: resident across the grid
            pl.BlockSpec((C_out, C_tot), fix),    # conv weight: resident
            pl.BlockSpec((C_out, 1), fix),        # bias: resident
        ],
        out_specs=o_spec,
        scratch_shapes=[pltpu.VMEM((N, C_tot * Lt), jnp.float32)],
        compiler_params=pltpu.CompilerParams(
            dimension_semantics=dims,             # no cross-step state -> megacore-splittable
            vmem_limit_bytes=vmem_limit,
        ),
    )(x_in, a, conv_w, bias)
    # TODO(synk): if a profile at production shapes shows exposed DMA, add
    # pipeline_mode=pl.Buffered(3) on the x BlockSpec (VMEM headroom permitting).

    return out.reshape(B, C_out, N, L)   # pure reshape; no wrapper transpose pass


def _reference(wave_feature, adj, conv_w, conv_b, *, gdep=1, alpha=0.05):
    """Pure-JAX reference mirroring the PyTorch sgcn forward."""
    N = adj.shape[0]
    a = adj + jnp.eye(N, dtype=adj.dtype)
    a = a / a.sum(axis=1, keepdims=True)
    x = wave_feature
    h = x
    outs = [h]
    for _ in range(gdep):
        h = alpha * x + (1.0 - alpha) * jnp.einsum('ncwl,vw->ncvl', h, a)
        outs.append(h)
    ho = jnp.concatenate(outs, axis=1)                           # (B, C_tot, N, L)
    return jnp.einsum('oc,bcnl->bonl', conv_w, ho) + conv_b[None, :, None, None]


if __name__ == "__main__":
    # Module defaults: input_channel=8, gcn_depth=1, hopalpha=0.05; small graph/seq/batch.
    # (At these toy sizes the kernel is overhead-bound; the structure above targets large
    #  B / L where the pipelined grid and stacked matmuls actually pay off.)
    B, C, N, L = 2, 8, 8, 16
    gdep, alpha = 1, 0.05
    C_out, C_tot = C, (gdep + 1) * C

    key = jax.random.PRNGKey(0)
    k_x, k_a, k_w, k_b = jax.random.split(key, 4)

    wave_feature = jax.random.normal(k_x, (B, C, N, L), dtype=jnp.float32)
    adj = jax.random.uniform(k_a, (N, N), dtype=jnp.float32)     # nonnegative -> safe row sums
    conv_w = jax.random.normal(k_w, (C_out, C_tot), dtype=jnp.float32) * 0.1
    conv_b = jax.random.normal(k_b, (C_out,), dtype=jnp.float32) * 0.1

    out = muti_level_wave_gcn(wave_feature, adj, conv_w, conv_b, gdep=gdep, alpha=alpha)
    out = jax.block_until_ready(out)

    ref = _reference(wave_feature, adj, conv_w, conv_b, gdep=gdep, alpha=alpha)
    assert out.shape == (B, C_out, N, L)
    assert jnp.allclose(out, ref, atol=1e-4, rtol=1e-4)

    print("KERNEL_OK")
</pallas_src>

<mosaic_0001>
module attributes {stable_mosaic.version = 11 : i64} {
  func.func @sgcn_kernel(%arg0: i32, %arg1: memref<1x8x128xf32, #tpu.memory_space<vmem>>, %arg2: memref<8x8xf32, #tpu.memory_space<vmem>>, %arg3: memref<8x16xf32, #tpu.memory_space<vmem>>, %arg4: memref<8x1xf32, #tpu.memory_space<vmem>>, %arg5: memref<1x8x128xf32, #tpu.memory_space<vmem>>, %arg6: memref<8x256xf32, #tpu.memory_space<vmem>>) attributes {dimension_semantics = [#tpu.dimension_semantics<parallel>], iteration_bounds = array<i64: 2>, scalar_prefetch = 0 : i64, scratch_operands = 1 : i64, tpu.core_type = #tpu.core_type<tc>, window_params = [{transform_indices = @transform_0, window_bounds = array<i64: 1, 8, 128>}, {pipeline_mode = #tpu.pipeline_mode<synchronous>, transform_indices = @transform_1, window_bounds = array<i64: 8, 8>}, {pipeline_mode = #tpu.pipeline_mode<synchronous>, transform_indices = @transform_2, window_bounds = array<i64: 8, 16>}, {pipeline_mode = #tpu.pipeline_mode<synchronous>, transform_indices = @transform_3, window_bounds = array<i64: 8, 1>}, {transform_indices = @transform_4, window_bounds = array<i64: 1, 8, 128>}]} {
    %c0 = arith.constant 0 : index
    %c0_0 = arith.constant 0 : index
    %c0_1 = arith.constant 0 : index
    %0 = vector.load %arg1[%c0, %c0_0, %c0_1] : memref<1x8x128xf32, #tpu.memory_space<vmem>>, vector<1x8x128xf32>
    %1 = vector.shape_cast %0 : vector<1x8x128xf32> to vector<8x8x16xf32>
    %c0_2 = arith.constant 0 : index
    %c0_3 = arith.constant 0 : index
    %2 = vector.load %arg2[%c0_2, %c0_3] : memref<8x8xf32, #tpu.memory_space<vmem>>, vector<8x8xf32>
    %3 = tpu.transpose %1, [1, 0, 2] : vector<8x8x16xf32> -> vector<8x8x16xf32>
    %4 = vector.shape_cast %3 : vector<8x8x16xf32> to vector<8x128xf32>
    %cst = arith.constant 5.000000e-02 : f32
    %5 = vector.broadcast %cst : f32 to vector<8x128xf32>
    %6 = arith.mulf %5, %4 : vector<8x128xf32>
    %c0_4 = arith.constant 0 : index
    %c0_5 = arith.constant 0 : index
    %7 = vector.load %arg6[%c0_4, %c0_5] : memref<8x256xf32, #tpu.memory_space<vmem>>, vector<8x128xf32>
    tpu.vector_store %arg6[%c0_4, %c0_5], %4 {strides = array<i32>} : memref<8x256xf32, #tpu.memory_space<vmem>>, vector<8x128xf32>,
    %cst_6 = arith.constant dense<0.000000e+00> : vector<8x128xf32>
    %8 = tpu.matmul %2, %4, %cst_6 {dimension_numbers = #tpu.dot_dimension_numbers<[1], [0], [0], [1], [0, 0, 1, 1], [], []>} : vector<8x8xf32>, vector<8x128xf32>, vector<8x128xf32> -> vector<8x128xf32>
    %9 = arith.addf %6, %8 : vector<8x128xf32>
    %c0_7 = arith.constant 0 : index
    %c128 = arith.constant 128 : index
    %10 = vector.load %arg6[%c0_7, %c128] : memref<8x256xf32, #tpu.memory_space<vmem>>, vector<8x128xf32>
    tpu.vector_store %arg6[%c0_7, %c128], %9 {strides = array<i32>} : memref<8x256xf32, #tpu.memory_space<vmem>>, vector<8x128xf32>,
    %c0_8 = arith.constant 0 : index
    %c0_9 = arith.constant 0 : index
    %11 = vector.load %arg6[%c0_8, %c0_9] : memref<8x256xf32, #tpu.memory_space<vmem>>, vector<8x256xf32>
    %12 = vector.shape_cast %11 : vector<8x256xf32> to vector<8x16x16xf32>
    %13 = tpu.transpose %12, [1, 0, 2] : vector<8x16x16xf32> -> vector<16x8x16xf32>
    %14 = vector.shape_cast %13 : vector<16x8x16xf32> to vector<16x128xf32>
    %c0_10 = arith.constant 0 : index
    %c0_11 = arith.constant 0 : index
    %15 = vector.load %arg3[%c0_10, %c0_11] : memref<8x16xf32, #tpu.memory_space<vmem>>, vector<8x16xf32>
    %cst_12 = arith.constant dense<0.000000e+00> : vector<8x128xf32>
    %16 = tpu.matmul %15, %14, %cst_12 {dimension_numbers = #tpu.dot_dimension_numbers<[1], [0], [0], [1], [0, 0, 1, 1], [], []>} : vector<8x16xf32>, vector<16x128xf32>, vector<8x128xf32> -> vector<8x128xf32>
    %c0_13 = arith.constant 0 : index
    %c0_14 = arith.constant 0 : index
    %17 = vector.load %arg4[%c0_13, %c0_14] : memref<8x1xf32, #tpu.memory_space<vmem>>, vector<8x1xf32>
    %18 = vector.broadcast %17 : vector<8x1xf32> to vector<8x128xf32>
    %19 = arith.addf %16, %18 : vector<8x128xf32>
    %20 = vector.shape_cast %19 : vector<8x128xf32> to vector<1x8x128xf32>
    %c0_15 = arith.constant 0 : index
    %c0_16 = arith.constant 0 : index
    %c0_17 = arith.constant 0 : index
    %21 = vector.load %arg5[%c0_15, %c0_16, %c0_17] : memref<1x8x128xf32, #tpu.memory_space<vmem>>, vector<1x8x128xf32>
    tpu.vector_store %arg5[%c0_15, %c0_16, %c0_17], %20 {strides = array<i32>} : memref<1x8x128xf32, #tpu.memory_space<vmem>>, vector<1x8x128xf32>,
    return
  }
  func.func @transform_0(%arg0: i32) -> (i32, i32, i32) {
    %c0_i32 = arith.constant 0 : i32
    %c0_i32_0 = arith.constant 0 : i32
    %c0_i32_1 = arith.constant 0 : i32
    return %arg0, %c0_i32, %c0_i32_0 : i32, i32, i32
  }
  func.func @transform_1(%arg0: i32) -> (i32, i32) {
    %c0_i32 = arith.constant 0 : i32
    %c0_i32_0 = arith.constant 0 : i32
    %c0_i32_1 = arith.constant 0 : i32
    return %c0_i32, %c0_i32_0 : i32, i32
  }
  func.func @transform_2(%arg0: i32) -> (i32, i32) {
    %c0_i32 = arith.constant 0 : i32
    %c0_i32_0 = arith.constant 0 : i32
    %c0_i32_1 = arith.constant 0 : i32
    return %c0_i32, %c0_i32_0 : i32, i32
  }
  func.func @transform_3(%arg0: i32) -> (i32, i32) {
    %c0_i32 = arith.constant 0 : i32
    %c0_i32_0 = arith.constant 0 : i32
    %c0_i32_1 = arith.constant 0 : i32
    return %c0_i32, %c0_i32_0 : i32, i32
  }
  func.func @transform_4(%arg0: i32) -> (i32, i32, i32) {
    %c0_i32 = arith.constant 0 : i32
    %c0_i32_0 = arith.constant 0 : i32
    %c0_i32_1 = arith.constant 0 : i32
    return %arg0, %c0_i32, %c0_i32_0 : i32, i32, i32
  }
}

</mosaic_0001>

<bundles_post_ra>
// kernel: tpu_custom_call.1
= control target key start
LH: loop header
LB: loop body
LE: loop exit
PB: predicated region body
PF: predicated region fallthrough
CT: control target
= control target key end

     0   :  { %9 = vsyncpa [#allocation4], 0  ;;  %s2646_s0 = inlined_call_operand.hbm [shape: f32[2,8,128], index: 0, kind: input, shape index: {}]   ;;  %s2647_s1 = inlined_call_operand.vmem [shape: f32[8,8], index: 1, kind: input, shape index: {}]   ;;  %s2648_s2 = inlined_call_operand.hbm [shape: f32[8,16], index: 2, kind: input, shape index: {}]   ;;  %s2649_s3 = inlined_call_operand.vmem [shape: f32[8,1], index: 3, kind: input, shape index: {}]   ;;  %s2650_s4 = inlined_call_operand.hbm [shape: f32[2,8,128], index: 4, kind: output, shape index: {}]  }
   0x1   :  { %11 = vsyncpa [#allocation4 + $0x1], 0 }
   0x2   :  { %12 = vsyncpa [#allocation7], 0 }
   0x3   :  { %13 = vsyncpa [#allocation5], 0 }
   0x4   :  { %15 = vsyncpa [#allocation5 + $0x1], 0  ;;  %s2200_s15 = smov 0   ;;  %s2202_s16 = smov 0  }
   0x5   :  { %s2204_s17 = smov 0   ;;  %s2206_s18 = smov 0  }
   0x6 LB: > { %s2221_s19 = sadd.s32 4294967295, %s2158_s18   ;;  %s1885_s20 = sadd.s32 4294967294, %s2158_s18   ;;  %s2158_s18 = sphi %s2206_s18, %s2673_s18   ;;  %s2154_s17 = sphi %s2204_s17, %s2672_s17   ;;  %s2150_s16 = sphi %s2202_s16, %s2671_s16   ;;  %s2146_s15 = sphi %s2200_s15, %s2670_s15  }
   0x7   : > { %p41_p0 = scmp.ne.s32.totalorder %s2150_s16, %s2146_s15  ;;  %p2651_p1 = scmp.eq.s32.totalorder %s2221_s19, 0 }
   0x8   : > { %p134_p3 = scmp.eq.s32.totalorder %s1885_s20, 1  ;;  %p1886_p5 = scmp.ge.s32.totalorder %s2158_s18, 1 }
   0x9   : > { %p2230_p4 = por %p2651_p1, %p41_p0  ;;  %p141_p7 = scmp.lt.s32.totalorder %s2158_s18, 3 }
   0xa   : > { %p2235_p6 = por %p134_p3, %p41_p0  ;;  %s2160_s24 = smov [#allocation6]  }
   0xb   : > { %s2655_s21 = scalar_select %p2230_p4, 1, 0 }
   0xc   : > { %s2656_s22 = scalar_select %p2235_p6, 1, 0 }
   0xd   : > { %p2240_p8 = pnand %p1886_p5, %p141_p7  ;;  %s157_s25 = sshll.u32 %s2160_s24, 4  ;;  %s158_s25 = int_to_ptr.vmem [resolvable:$true] %s157_s25 }
   0xe   : > { %s2248_s26 = sadd.s32 1, %s2158_s18   ;;  %s28_s30 = sadd.s32 1, %s2154_s17 }
   0xf   : > { %s2657_s23 = scalar_select %p2240_p8, 1, 0 }
  0x10   : > { %p1974_p10 = pneg %p2240_p8  ;;  %s25_s28 = ssub.s32 %s2158_s18, %s2248_s26 }
  0x11   : > { %p2258_p12 = scmp.eq.s32.totalorder %s25_s28, 0  ;;  %p35_p13 = scmp.ne.s32.totalorder %s2154_s17, %s2150_s16 }
  0x12   : > { %p2252_p11 = pnand %p1974_p10, %p2651_p1  ;;  %s2047_s5 = scalar_lea.vmem %s158_s25, 128 }
  0x13   : > { %p2048_p3 = scmp.ne.s32.totalorder %s158_s25, %s2047_s5  ;;  %p2055_p9 = scmp.lt.s32.totalorder %s158_s25, %s158_s25 }
  0x14   : > { %p2038_p0 = pneg %p2252_p11  ;;  %p2056_p2 = scmp.lt.s32.totalorder %s2047_s5, %s2047_s5 }
  0x16   : > { %p2050_p5 = pnand %p2048_p3, %p2038_p0  ;;  %p2057_p10 = por %p2056_p2, %p2055_p9 }
  0x18   : > { %p2051_p7 = pneg %p2050_p5 }
  0x1a   : > { %p2058_p1 = pnand %p2057_p10, %p2051_p7 }
  0x1c   : > { %2061 = shalt.err (!%p2058_p1)
}
  0x1d   : > { %1977 = dma.hbm_to_vmem [thread:$0]  (!%p2252_p11), %s2648_s2, 128, %s158_s25, [#allocation7]  }
  0x1e   : > { %s2275_s8 = scalar_select %p2258_p12, %s2154_s17, %s28_s30  }
  0x1f   : > { %p36_p1 = scmp.eq.s32.totalorder %s2158_s18, 0  ;;  %p2660_p2 = scmp.eq.s32.totalorder %s2221_s19, 1 }
  0x20   : > { %p1987_p0 = scmp.lt.s32.totalorder %s2158_s18, 2  ;;  %s171_s10 = sand.u32 1, %s2154_s17  }
  0x21   : > { %p2283_p9 = por %p2660_p2, %p35_p13  ;;  %p37_p3 = por %p36_p1, %p35_p13 }
  0x22   : > { %s1889_s11 = sshll.u32 %s171_s10, 3  ;;  %s1890_s12 = sshll.u32 %s2158_s18, 7 }
  0x23   : > { %s2661_s9 = scalar_select %p2283_p9, 1, 0 }
  0x24   : > { %s2296_s20 = scalar_lea.hbm %s2646_s0, %s1890_s12  ;;  %s175_s24 = scalar_lea.vmem [#allocation3], %s1889_s11 }
  0x25   : > { %s182_s25 = sshll.u32 %s175_s24, 4  ;;  %p2298_p11 = pnand %p1987_p0, %p37_p3  ;;  %s183_s25 = int_to_ptr.vmem [resolvable:$true] %s182_s25 }
  0x26   : > { %s172_s28 = scalar_lea.sflag [#allocation4], %s171_s10  ;;  %s2062_s29 = scalar_lea.hbm %s2296_s20, 128 }
  0x27   : > { %p2063_p12 = scmp.ne.s32.totalorder %s2296_s20, %s2062_s29  ;;  %p2064_p13 = pneg %p2298_p11 }
  0x28   : > { %s2067_s6 = scalar_lea.hbm %s2646_s0, 256  ;;  %p2068_p10 = scmp.lt.s32.totalorder %s2296_s20, %s2646_s0 }
  0x29   : > { %p2065_p5 = pnand %p2064_p13, %p2063_p12  ;;  %p2069_p1 = scmp.lt.s32.totalorder %s2067_s6, %s2062_s29 }
  0x2b   : > { %p2066_p7 = pneg %p2065_p5  ;;  %p2070_p2 = por %p2069_p1, %p2068_p10 }
  0x2d   : > { %p2071_p0 = pnand %p2070_p2, %p2066_p7 }
  0x2f   : > { %2074 = shalt.err (!%p2071_p0)
}
  0x30   : > { %s2075_s12 = scalar_lea.vmem %s183_s25, 128  ;;  %s2161_s10 = smov [#allocation3]  }
  0x31   : > { %p2076_p3 = scmp.ne.s32.totalorder %s183_s25, %s2075_s12  ;;  %s2080_s13 = sshll.u32 %s2161_s10, 4  ;;  %s2081_s13 = int_to_ptr.vmem [resolvable:$false] %s2080_s13 }
  0x32   : > { %s2082_s14 = scalar_lea.vmem %s2081_s13, 256  ;;  %p2083_p12 = scmp.lt.s32.totalorder %s183_s25, %s2081_s13 }
  0x33   : > { %p2078_p6 = pnand %p2076_p3, %p2064_p13  ;;  %p2084_p5 = scmp.lt.s32.totalorder %s2082_s14, %s2075_s12 }
  0x35   : > { %p2079_p9 = pneg %p2078_p6  ;;  %p2085_p4 = por %p2084_p5, %p2083_p12 }
  0x37   : > { %p2086_p8 = pnand %p2085_p4, %p2079_p9 }
  0x39   : > { %2089 = shalt.err (!%p2086_p8)
}
  0x3a   : > { %1981 = dma.hbm_to_vmem [thread:$0]  (!%p2298_p11), %s2296_s20, 128, %s183_s25, %s172_s28  }
  0x3b   : > { %p2663_p7 = scmp.ne.s32.totalorder %s2657_s23, 0 }
  0x3c   : > { %s2319_s24 = sand.u32 (!%p2663_p7), 1, %s2150_s16   ;;  %p2664_p4 = scmp.ne.s32.totalorder (!%p2663_p7), %s2655_s21, 0 }
  0x3d   : > { %191 = sbr.rel (%p2663_p7) target bundleno = 1059 (0x423), region = 36  ;;  %s1892_s29 = sshll.u32 (!%p2663_p7), %s2319_s24, 3 }
  0x3e   : > { %s194_s30 = scalar_lea.sflag (!%p2663_p7), [#allocation4], %s2319_s24  ;;  %s197_s5 = scalar_lea.vmem (!%p2663_p7), [#allocation3], %s1892_s29 }
  0x42   : > { %2133 = dma.done.wait (%p2664_p4), %s194_s30, 128  }
  0x43   : > { %2135 = vsyncadd (%p2664_p4), %s194_s30, 4294967168  ;;  %p2665_p6 = scmp.eq.s32.totalorder %s2221_s19, 0 }
  0x45   : > { %2137 = dma.done.wait (%p2665_p6), [#allocation7], 128   ;;  %p2666_p8 = pmov %p2665_p6 }
  0x46   : > { %v226_v0 = vld [vmem:[%s197_s5] sm:$0xff]  ;;  %s2162_s23 = smov 80   ;;  %s2163_s20 = smov 112   ;;  %v2169_v1 = vmov 1983009808   ;;  %v254_v3 = vlaneseq  ;;  %vm2172_vm0 = vmmov 0  }
  0x47   : > { %2139 = vsyncadd (%p2666_p8), [#allocation7], 4294967168  ;;  %234 = vrot.lane.b32.xlu1 %v226_v0, %s2162_s23  ;;  %228 = vrot.lane.b32.xlu0 %v226_v0, %s2163_s20  ;;  %s2164_s25 = smov 64   ;;  %s2165_s27 = smov 96   ;;  %v252_v2 = vunpack.c.l.s4 %v2169_v1  ;;  %v2170_v4 = vmov 1934713408  }
  0x48   : > { %s2166_s21 = smov 32   ;;  %s2167_s28 = smov 48   ;;  %v316_v5 = vunpack.c.l.s4 %v2170_v4  ;;  %v255_v7 = vshrl.u32 %v254_v3, 7  ;;  %vm686_vm1 = vcmask 130048   ;;  %vm688_vm2 = vcmask 261120  }
  0x49   : > { %s2168_s6 = smov 16   ;;  %v253_v6 = vunpack.c.0.s8 %v252_v2  ;;  %vm690_vm3 = vcmask 392192   ;;  %vm692_vm4 = vcmask 523264   ;;  %vm694_vm5 = vcmask 654336   ;;  %s1946_s13 = sshll.u32 %s2221_s19, 7 }
  0x4a   : > { %v317_v10 = vunpack.c.0.s8 %v316_v5  ;;  %vm696_vm6 = vcmask 785408   ;;  %vm698_vm7 = vcmask 916480   ;;  %vm702_vm8 = vcmask 64512   ;;  %s225_s14 = scalar_lea.vmem [#allocation8], %s1892_s29  ;;  %p2667_p11 = scmp.ne.s32.totalorder %s2661_s9, 0 }
  0x4b   : > { %237 = vrot.lane.b32.xlu1 %v226_v0, %s2164_s25  ;;  %231 = vrot.lane.b32.xlu0 %v226_v0, %s2165_s27  ;;  %v2340_v11 = vsub.s32 %v253_v6, %v255_v7  ;;  %s1805_s30 = sshll.u32 %s225_s14, 4  ;;  %s2174_s19 = smov [#allocation8]   ;;  %s1806_s30 = int_to_ptr.vmem [resolvable:$true] %s1805_s30 }
  0x4c   : > { %v2342_v18 = vsub.s32 %v317_v10, %v255_v7 }
  0x4f   : > { %243 = vrot.lane.b32.xlu1 %v226_v0, %s2166_s21  ;;  %240 = vrot.lane.b32.xlu0 %v226_v0, %s2167_s28 }
  0x53   : > { %246 = vrot.lane.b32.xlu0 %v226_v0, %s2168_s6 }
  0xb9   : > { %v235_v8 = vpop.permute.xlu1 %234  ;;  %v229_v9 = vpop.permute.xlu0 %228 }
  0xba   : > { %v265_v12 = vcombine.low %v229_v9, %v235_v8  ;;  %v266_v13 = vcombine.high %v229_v9, %v235_v8 }
  0xbc   : > { %v273_v19 = vrot.slane %v265_v12, %v2340_v11  ;;  %v280_v20 = vrot.slane %v266_v13, %v2340_v11 }
  0xbd   : > { %v238_v14 = vpop.permute.xlu1 %237  ;;  %v232_v15 = vpop.permute.xlu0 %231 }
  0xbe   : > { %v249_v16 = vcombine.low %v226_v0, %v232_v15  ;;  %v250_v17 = vcombine.high %v226_v0, %v232_v15 }
  0xc0   : > { %v257_v21 = vrot.slane %v249_v16, %v2340_v11  ;;  %v264_v22 = vrot.slane %v250_v17, %v2340_v11 }
  0xc1   : > { %v241_v23 = vpop.permute.xlu0 %240  ;;  %v244_v28 = vpop.permute.xlu1 %243 }
  0xc2   : > { %v313_v24 = vcombine.low %v257_v21, %v273_v19  ;;  %v314_v25 = vcombine.high %v257_v21, %v273_v19  ;;  %v329_v26 = vcombine.low %v264_v22, %v280_v20  ;;  %v330_v27 = vcombine.high %v264_v22, %v280_v20 }
  0xc3   : > { %v281_v33 = vcombine.low %v238_v14, %v244_v28  ;;  %v282_v34 = vcombine.high %v238_v14, %v244_v28 }
  0xc4   : > { %v321_v29 = vrot.slane %v313_v24, %v2342_v18  ;;  %v328_v30 = vrot.slane %v314_v25, %v2342_v18  ;;  %v337_v31 = vrot.slane %v329_v26, %v2342_v18  ;;  %v344_v32 = vrot.slane %v330_v27, %v2342_v18 }
  0xc5   : > { %v247_v35 = vpop.permute.xlu0 %246  ;;  %v289_v46 = vrot.slane %v281_v33, %v2340_v11  ;;  %v296_v47 = vrot.slane %v282_v34, %v2340_v11 }
  0xc6   : > { %v1895_v36 = vcombine.low %v321_v29, %v328_v30  ;;  %v1897_v37 = vcombine.high %v321_v29, %v328_v30  ;;  %v1899_v38 = vcombine.low %v337_v31, %v344_v32  ;;  %v1901_v39 = vcombine.high %v337_v31, %v344_v32 }
  0xc7   : > { %v297_v40 = vcombine.low %v241_v23, %v247_v35  ;;  %v298_v41 = vcombine.high %v241_v23, %v247_v35 }
  0xc8   : > { %v394_v42 = vrot.slane %v1895_v36, %v2340_v11  ;;  %v410_v43 = vrot.slane %v1897_v37, %v2340_v11  ;;  %v426_v44 = vrot.slane %v1899_v38, %v2340_v11  ;;  %v442_v45 = vrot.slane %v1901_v39, %v2340_v11 }
  0xc9   : > { %v305_v48 = vrot.slane %v297_v40, %v2340_v11  ;;  %v312_v49 = vrot.slane %v298_v41, %v2340_v11 }
  0xca   : > { %v450_v50 = vcombine.low %v394_v42, %v410_v43  ;;  %v451_v51 = vcombine.high %v394_v42, %v410_v43  ;;  %v482_v56 = vcombine.low %v426_v44, %v442_v45  ;;  %v483_v57 = vcombine.high %v426_v44, %v442_v45 }
  0xcb   : > { %v345_v52 = vcombine.low %v289_v46, %v305_v48  ;;  %v346_v53 = vcombine.high %v289_v46, %v305_v48  ;;  %v361_v54 = vcombine.low %v296_v47, %v312_v49  ;;  %v362_v55 = vcombine.high %v296_v47, %v312_v49 }
  0xcc   : > { %v458_v58 = vrot.slane %v450_v50, %v2342_v18  ;;  %v465_v59 = vrot.slane %v451_v51, %v2342_v18  ;;  %v490_v6 = vrot.slane %v482_v56, %v2342_v18  ;;  %v497_v7 = vrot.slane %v483_v57, %v2342_v18 }
  0xcd   : > { %v353_v60 = vrot.slane %v345_v52, %v2342_v18  ;;  %v360_v61 = vrot.slane %v346_v53, %v2342_v18  ;;  %v369_v62 = vrot.slane %v361_v54, %v2342_v18  ;;  %v376_v63 = vrot.slane %v362_v55, %v2342_v18 }
  0xce   : > { %v1903_v4 = vcombine.low %v458_v58, %v465_v59  ;;  %v1905_v5 = vcombine.high %v458_v58, %v465_v59  ;;  %v1904_v20 = vcombine.low %v490_v6, %v497_v7  ;;  %v1906_v21 = vcombine.high %v490_v6, %v497_v7 }
  0xcf   : > { %v1896_v0 = vcombine.low %v353_v60, %v360_v61  ;;  %v1898_v1 = vcombine.high %v353_v60, %v360_v61  ;;  %v1900_v2 = vcombine.low %v369_v62, %v376_v63  ;;  %v1902_v3 = vcombine.high %v369_v62, %v376_v63 }
  0xd0   : > { %v530_v17 = vrot.slane %v1903_v4, %v2340_v11  ;;  %v546_v19 = vrot.slane %v1905_v5, %v2340_v11  ;;  %v537_v32 = vrot.slane %v1904_v20, %v2340_v11  ;;  %v553_v33 = vrot.slane %v1906_v21, %v2340_v11 }
  0xd1   : > { %v401_v8 = vrot.slane %v1896_v0, %v2340_v11  ;;  %v417_v9 = vrot.slane %v1898_v1, %v2340_v11  ;;  %v433_v10 = vrot.slane %v1900_v2, %v2340_v11  ;;  %v449_v12 = vrot.slane %v1902_v3, %v2340_v11 }
  0xd2   : > { %v587_v30 = vcombine.high %v530_v17, %v546_v19  ;;  %v586_v31 = vcombine.low %v530_v17, %v546_v19  ;;  %v602_v41 = vcombine.low %v537_v32, %v553_v33  ;;  %v603_v52 = vcombine.high %v537_v32, %v553_v33 }
  0xd3   : > { %v466_v13 = vcombine.low %v401_v8, %v417_v9  ;;  %v467_v14 = vcombine.high %v401_v8, %v417_v9  ;;  %v498_v15 = vcombine.low %v433_v10, %v449_v12  ;;  %v499_v16 = vcombine.high %v433_v10, %v449_v12  ;;  %v385_v12 = vld [vmem:[%s2647_s1] sm:$0xff] }
  0xd4   : > { %v601_v42 = vrot.slane %v587_v30, %v2342_v18  ;;  %v594_v44 = vrot.slane %v586_v31, %v2342_v18  ;;  %v610_v51 = vrot.slane %v602_v41, %v2342_v18  ;;  %v2171_v53 = vmov 0.0  }
  0xd5   : > { %v474_v22 = vrot.slane %v466_v13, %v2342_v18  ;;  %v481_v23 = vrot.slane %v467_v14, %v2342_v18  ;;  %v506_v24 = vrot.slane %v498_v15, %v2342_v18  ;;  %v513_v25 = vrot.slane %v499_v16, %v2342_v18  ;;  %1954 = vmatprep.subr.mxu0 %v2171_v53 }
  0xd6   : > { %1956 = vmatprep.mubr.msk.f32.mxu0 %vm2172_vm0, %v2171_v53  ;;  %1959 = vmatprep.subr.mxu1 %v2171_v53  ;;  %v617_v57 = vrot.slane %v603_v52, %v2342_v18 }
  0xd7   : > { %v1907_v26 = vcombine.low %v474_v22, %v481_v23  ;;  %v1909_v27 = vcombine.high %v474_v22, %v481_v23  ;;  %v1908_v28 = vcombine.low %v506_v24, %v513_v25  ;;  %v1910_v29 = vcombine.high %v506_v24, %v513_v25  ;;  %1963 = vmatprep.mubr.msk.f32.mxu1 %vm2172_vm0, %v2171_v53 }
  0xd9   : > { %v562_v34 = vrot.slane %v1907_v26, %v2340_v11  ;;  %v578_v35 = vrot.slane %v1909_v27, %v2340_v11  ;;  %v569_v36 = vrot.slane %v1908_v28, %v2340_v11  ;;  %v585_v37 = vrot.slane %v1910_v29, %v2340_v11 }
  0xdb   : > { %v619_v38 = vcombine.high %v562_v34, %v578_v35  ;;  %v618_v39 = vcombine.low %v562_v34, %v578_v35  ;;  %v634_v40 = vcombine.low %v569_v36, %v585_v37  ;;  %v635_v49 = vcombine.high %v569_v36, %v585_v37 }
  0xdd   : > { %v633_v43 = vrot.slane %v619_v38, %v2342_v18  ;;  %v626_v45 = vrot.slane %v618_v39, %v2342_v18  ;;  %v642_v48 = vrot.slane %v634_v40, %v2342_v18  ;;  %v649_v56 = vrot.slane %v635_v49, %v2342_v18 }
  0xdf   : > { %v652_v46 = vcombine.low %v601_v42, %v633_v43  ;;  %v651_v47 = vcombine.high %v594_v44, %v626_v45  ;;  %v650_v50 = vcombine.low %v594_v44, %v626_v45  ;;  %v654_v54 = vcombine.low %v610_v51, %v642_v48 }
  0xe0   : > { %v653_v55 = vcombine.high %v601_v42, %v633_v43  ;;  %v656_v58 = vcombine.low %v617_v57, %v649_v56  ;;  %v655_v59 = vcombine.high %v610_v51, %v642_v48  ;;  %v657_v60 = vcombine.high %v617_v57, %v649_v56 }
  0xe1   : > { %663 = vrot.lane.b32.xlu0 %v652_v46, %s2166_s21  ;;  %659 = vrot.lane.b32.xlu1 %v651_v47, %s2168_s6 }
  0xe5   : > { %671 = vrot.lane.b32.xlu0 %v654_v54, %s2164_s25  ;;  %667 = vrot.lane.b32.xlu1 %v653_v55, %s2167_s28 }
  0xe9   : > { %679 = vrot.lane.b32.xlu0 %v656_v58, %s2165_s27  ;;  %675 = vrot.lane.b32.xlu1 %v655_v59, %s2162_s23 }
  0xed   : > { %683 = vrot.lane.b32.xlu1 %v657_v60, %s2163_s20 }
 0x153   : > { %v664_v61 = vpop.permute.xlu0 %663  ;;  %v660_v62 = vpop.permute.xlu1 %659 }
 0x154   : > { %v687_v63 = vsel %vm686_vm1, %v650_v50, %v660_v62 }
 0x155   : > { %v689_v2 = vsel %vm688_vm2, %v687_v63, %v664_v61 }
 0x157   : > { %v672_v0 = vpop.permute.xlu0 %671  ;;  %v668_v1 = vpop.permute.xlu1 %667 }
 0x158   : > { %v691_v3 = vsel %vm690_vm3, %v689_v2, %v668_v1 }
 0x159   : > { %v693_v5 = vsel %vm692_vm4, %v691_v3, %v672_v0 }
 0x15b   : > { %v676_v4 = vpop.permute.xlu1 %675  ;;  %v680_v6 = vpop.permute.xlu0 %679 }
 0x15c   : > { %v695_v7 = vsel %vm694_vm5, %v693_v5, %v676_v4 }
 0x15d   : > { %v697_v9 = vsel %vm696_vm6, %v695_v7, %v680_v6 }
 0x15f   : > { %v684_v8 = vpop.permute.xlu1 %683 }
 0x160   : > { %v699_v10 = vsel %vm698_vm7, %v697_v9, %v684_v8 }
 0x161   : > { %784 = vrot.lane.b32.xlu0 %v699_v10, %s2165_s27  ;;  %781 = vrot.lane.b32.xlu1 %v699_v10, %s2163_s20  ;;  %v700_v13 = vmul.f32 0.05, %v699_v10 }
 0x162   : > { %1955 = vmatpush3.msra.mxu0 %v699_v10 }
 0x163   : > { %1957 = vmatmul.mubr.msk.f32.vlgmr.msra.gmra.mxu0 %vm702_vm8, %v385_v12 }
 0x165   : > { %790 = vrot.lane.b32.xlu0 %v699_v10, %s2164_s25  ;;  %787 = vrot.lane.b32.xlu1 %v699_v10, %s2162_s23 }
 0x169   : > { %793 = vrot.lane.b32.xlu1 %v699_v10, %s2167_s28 }
 0x1d3   : > { %v782_v17 = vpop.permute.xlu1 %781  ;;  %v785_v20 = vpop.permute.xlu0 %784 }
 0x1d4   : > { %v824_v22 = vcombine.low %v699_v10, %v785_v20  ;;  %v825_v28 = vcombine.high %v699_v10, %v785_v20 }
 0x1d6   : > { %v832_v24 = vrot.slane %v824_v22, %v2340_v11  ;;  %v839_v32 = vrot.slane %v825_v28, %v2340_v11 }
 0x1d7   : > { %v788_v19 = vpop.permute.xlu1 %787  ;;  %v2437_v41 = vpop.permute.xlu0 %790 }
 0x1d8   : > { %v840_v21 = vcombine.low %v782_v17, %v788_v19  ;;  %v841_v27 = vcombine.high %v782_v17, %v788_v19 }
 0x1da   : > { %v848_v23 = vrot.slane %v840_v21, %v2340_v11  ;;  %v855_v31 = vrot.slane %v841_v27, %v2340_v11 }
 0x1db   : > { %v794_v44 = vpop.permute.xlu1 %793 }
 0x1dc   : > { %v888_v25 = vcombine.low %v832_v24, %v848_v23  ;;  %v889_v26 = vcombine.high %v832_v24, %v848_v23  ;;  %v904_v35 = vcombine.low %v839_v32, %v855_v31  ;;  %v905_v36 = vcombine.high %v839_v32, %v855_v31 }
 0x1de   : > { %v896_v29 = vrot.slane %v888_v25, %v2342_v18  ;;  %v903_v30 = vrot.slane %v889_v26, %v2342_v18  ;;  %v912_v39 = vrot.slane %v904_v35, %v2342_v18  ;;  %v919_v40 = vrot.slane %v905_v36, %v2342_v18 }
 0x1e0   : > { %v1912_v33 = vcombine.low %v896_v29, %v903_v30  ;;  %v1914_v34 = vcombine.high %v896_v29, %v903_v30  ;;  %v1916_v45 = vcombine.low %v912_v39, %v919_v40  ;;  %v1918_v46 = vcombine.high %v912_v39, %v919_v40 }
 0x1e2   : > { %v1104_v37 = vrot.slane %v1912_v33, %v2340_v11  ;;  %v1120_v38 = vrot.slane %v1914_v34, %v2340_v11  ;;  %v1136_v51 = vrot.slane %v1916_v45, %v2340_v11  ;;  %v1152_v52 = vrot.slane %v1918_v46, %v2340_v11 }
 0x1e4   : > { %v1160_v42 = vcombine.low %v1104_v37, %v1120_v38  ;;  %v1161_v43 = vcombine.high %v1104_v37, %v1120_v38  ;;  %v1192_v62 = vcombine.low %v1136_v51, %v1152_v52  ;;  %v1193_v3 = vcombine.high %v1136_v51, %v1152_v52 }
 0x1e6   : > { %v1168_v49 = vrot.slane %v1160_v42, %v2342_v18  ;;  %v1175_v50 = vrot.slane %v1161_v43, %v2342_v18  ;;  %v2465_v26 = vrot.slane %v1193_v3, %v2342_v18 }
 0x1e8   : > { %v1928_v58 = vcombine.low %v1168_v49, %v1175_v50  ;;  %v1930_v59 = vcombine.high %v1168_v49, %v1175_v50 }
 0x1ea   : > { %v2448_v6 = vrot.slane %v1928_v58, %v2340_v11  ;;  %v2451_v7 = vrot.slane %v1930_v59, %v2340_v11 }
 0x1ec   : > { %v1432_v25 = vcombine.low %v2448_v6, %v2451_v7 }
 0x223   : > { %v772_v14 = vpop.f32.mrf.mxu0 }
 0x224   : > { %v776_v15 = vadd.f32 %v772_v14, %v700_v13 }
 0x225   : > { %v1958_v16 = vpop.f32.mrf.mxu0 }
 0x226   : > { %806 = vrot.lane.b32.xlu1 %v776_v15, %s2165_s27  ;;  %803 = vrot.lane.b32.xlu0 %v776_v15, %s2163_s20 }
 0x22a   : > { %812 = vrot.lane.b32.xlu1 %v776_v15, %s2164_s25  ;;  %809 = vrot.lane.b32.xlu0 %v776_v15, %s2162_s23 }
 0x22e   : > { %818 = vrot.lane.b32.xlu1 %v776_v15, %s2166_s21  ;;  %815 = vrot.lane.b32.xlu0 %v776_v15, %s2167_s28 }
 0x232   : > { %799 = vrot.lane.b32.xlu1 %v699_v10, %s2168_s6  ;;  %821 = vrot.lane.b32.xlu0 %v776_v15, %s2168_s6 }
 0x236   : > { %796 = vrot.lane.b32.xlu0 %v699_v10, %s2166_s21 }
 0x298   : > { %v807_v47 = vpop.permute.xlu1 %806  ;;  %v804_v48 = vpop.permute.xlu0 %803 }
 0x299   : > { %v960_v54 = vcombine.low %v776_v15, %v807_v47  ;;  %v961_v55 = vcombine.high %v776_v15, %v807_v47  ;;  %v2454_v15 = vrot.slane %v1192_v62, %v2342_v18 }
 0x29b   : > { %v968_v63 = vrot.slane %v960_v54, %v2340_v11  ;;  %v975_v0 = vrot.slane %v961_v55, %v2340_v11 }
 0x29c   : > { %v813_v56 = vpop.permute.xlu1 %812  ;;  %v810_v57 = vpop.permute.xlu0 %809 }
 0x29d   : > { %v976_v60 = vcombine.low %v804_v48, %v810_v57  ;;  %v977_v61 = vcombine.high %v804_v48, %v810_v57 }
 0x29f   : > { %v984_v1 = vrot.slane %v976_v60, %v2340_v11  ;;  %v991_v2 = vrot.slane %v977_v61, %v2340_v11 }
 0x2a0   : > { %v819_v4 = vpop.permute.xlu1 %818  ;;  %v816_v5 = vpop.permute.xlu0 %815 }
 0x2a1   : > { %v1024_v8 = vcombine.low %v968_v63, %v984_v1  ;;  %v1025_v9 = vcombine.high %v968_v63, %v984_v1  ;;  %v1040_v10 = vcombine.low %v975_v0, %v991_v2  ;;  %v1041_v12 = vcombine.high %v975_v0, %v991_v2 }
 0x2a2   : > { %v992_v13 = vcombine.low %v813_v56, %v819_v4  ;;  %v993_v14 = vcombine.high %v813_v56, %v819_v4 }
 0x2a3   : > { %v1032_v16 = vrot.slane %v1024_v8, %v2342_v18  ;;  %v1039_v17 = vrot.slane %v1025_v9, %v2342_v18  ;;  %v1048_v19 = vrot.slane %v1040_v10, %v2342_v18  ;;  %v1055_v20 = vrot.slane %v1041_v12, %v2342_v18 }
 0x2a4   : > { %v1000_v21 = vrot.slane %v992_v13, %v2340_v11  ;;  %v1007_v22 = vrot.slane %v993_v14, %v2340_v11  ;;  %v800_v23 = vpop.permute.xlu1 %799  ;;  %v822_v24 = vpop.permute.xlu0 %821 }
 0x2a5   : > { %v1920_v27 = vcombine.low %v1032_v16, %v1039_v17  ;;  %v1922_v28 = vcombine.high %v1032_v16, %v1039_v17  ;;  %v1924_v29 = vcombine.low %v1048_v19, %v1055_v20  ;;  %v1926_v30 = vcombine.high %v1048_v19, %v1055_v20 }
 0x2a6   : > { %v872_v31 = vcombine.low %v794_v44, %v800_v23  ;;  %v873_v32 = vcombine.high %v794_v44, %v800_v23  ;;  %v1008_v33 = vcombine.low %v816_v5, %v822_v24  ;;  %v1009_v34 = vcombine.high %v816_v5, %v822_v24 }
 0x2a7   : > { %v1240_v35 = vrot.slane %v1920_v27, %v2340_v11  ;;  %v1256_v36 = vrot.slane %v1922_v28, %v2340_v11  ;;  %v2470_v37 = vrot.slane %v1924_v29, %v2340_v11  ;;  %v2473_v38 = vrot.slane %v1926_v30, %v2340_v11 }
 0x2a8   : > { %v880_v39 = vrot.slane %v872_v31, %v2340_v11  ;;  %v887_v40 = vrot.slane %v873_v32, %v2340_v11  ;;  %v1016_v42 = vrot.slane %v1008_v33, %v2340_v11  ;;  %v1023_v43 = vrot.slane %v1009_v34, %v2340_v11  ;;  %v797_v44 = vpop.permute.xlu0 %796 }
 0x2a9   : > { %v1296_v45 = vcombine.low %v1240_v35, %v1256_v36  ;;  %v1297_v46 = vcombine.high %v1240_v35, %v1256_v36  ;;  %v1328_v47 = vcombine.low %v2470_v37, %v2473_v38  ;;  %v1329_v48 = vcombine.high %v2470_v37, %v2473_v38 }
 0x2aa   : > { %v1056_v49 = vcombine.low %v1000_v21, %v1016_v42  ;;  %v1057_v50 = vcombine.high %v1000_v21, %v1016_v42  ;;  %v1072_v51 = vcombine.low %v1007_v22, %v1023_v43  ;;  %v1073_v52 = vcombine.high %v1007_v22, %v1023_v43 }
 0x2ab   : > { %v856_v54 = vcombine.low %v2437_v41, %v797_v44  ;;  %v857_v55 = vcombine.high %v2437_v41, %v797_v44  ;;  %v1304_v56 = vrot.slane %v1296_v45, %v2342_v18  ;;  %v1311_v57 = vrot.slane %v1297_v46, %v2342_v18 }
 0x2ac   : > { %v1064_v58 = vrot.slane %v1056_v49, %v2342_v18  ;;  %v1071_v59 = vrot.slane %v1057_v50, %v2342_v18  ;;  %v1080_v60 = vrot.slane %v1072_v51, %v2342_v18  ;;  %v1087_v61 = vrot.slane %v1073_v52, %v2342_v18 }
 0x2ad   : > { %v864_v62 = vrot.slane %v856_v54, %v2340_v11  ;;  %v871_v63 = vrot.slane %v857_v55, %v2340_v11  ;;  %v1936_v0 = vcombine.low %v1304_v56, %v1311_v57  ;;  %v1938_v1 = vcombine.high %v1304_v56, %v1311_v57 }
 0x2ae   : > { %v1921_v2 = vcombine.low %v1064_v58, %v1071_v59  ;;  %v1923_v41 = vcombine.high %v1064_v58, %v1071_v59  ;;  %v1925_v3 = vcombine.low %v1080_v60, %v1087_v61  ;;  %v1927_v4 = vcombine.high %v1080_v60, %v1087_v61 }
 0x2af   : > { %v920_v5 = vcombine.low %v864_v62, %v880_v39  ;;  %v921_v8 = vcombine.high %v864_v62, %v880_v39  ;;  %v936_v9 = vcombine.low %v871_v63, %v887_v40  ;;  %v937_v10 = vcombine.high %v871_v63, %v887_v40 }
 0x2b0   : > { %v1247_v12 = vrot.slane %v1921_v2, %v2340_v11  ;;  %v1263_v13 = vrot.slane %v1923_v41, %v2340_v11  ;;  %v1279_v14 = vrot.slane %v1925_v3, %v2340_v11  ;;  %v1295_v16 = vrot.slane %v1927_v4, %v2340_v11 }
 0x2b1   : > { %v928_v17 = vrot.slane %v920_v5, %v2342_v18  ;;  %v935_v19 = vrot.slane %v921_v8, %v2342_v18  ;;  %v944_v20 = vrot.slane %v936_v9, %v2342_v18  ;;  %v951_v21 = vrot.slane %v937_v10, %v2342_v18 }
 0x2b2   : > { %v1312_v22 = vcombine.low %v1247_v12, %v1263_v13  ;;  %v1313_v23 = vcombine.high %v1247_v12, %v1263_v13  ;;  %v1344_v24 = vcombine.low %v1279_v14, %v1295_v16  ;;  %v1345_v27 = vcombine.high %v1279_v14, %v1295_v16 }
 0x2b3   : > { %v1913_v28 = vcombine.low %v928_v17, %v935_v19  ;;  %v1915_v29 = vcombine.high %v928_v17, %v935_v19  ;;  %v1917_v30 = vcombine.low %v944_v20, %v951_v21  ;;  %v1919_v31 = vcombine.high %v944_v20, %v951_v21 }
 0x2b4   : > { %v1320_v32 = vrot.slane %v1312_v22, %v2342_v18  ;;  %v1327_v33 = vrot.slane %v1313_v23, %v2342_v18  ;;  %v2504_v34 = vrot.slane %v1936_v0, %v2340_v11  ;;  %v2507_v35 = vrot.slane %v1938_v1, %v2340_v11 }
 0x2b5   : > { %v1111_v36 = vrot.slane %v1913_v28, %v2340_v11  ;;  %v1127_v37 = vrot.slane %v1915_v29, %v2340_v11  ;;  %v1143_v38 = vrot.slane %v1917_v30, %v2340_v11  ;;  %v1159_v39 = vrot.slane %v1919_v31, %v2340_v11 }
 0x2b6   : > { %v1940_v40 = vcombine.low %v1320_v32, %v1327_v33  ;;  %v1942_v42 = vcombine.high %v1320_v32, %v1327_v33  ;;  %v1569_v43 = vcombine.high %v2504_v34, %v2507_v35  ;;  %v1336_v44 = vrot.slane %v1328_v47, %v2342_v18 }
 0x2b7   : > { %v1176_v45 = vcombine.low %v1111_v36, %v1127_v37  ;;  %v1177_v46 = vcombine.high %v1111_v36, %v1127_v37  ;;  %v1208_v49 = vcombine.low %v1143_v38, %v1159_v39  ;;  %v1209_v50 = vcombine.high %v1143_v38, %v1159_v39 }
 0x2b8   : > { %v1544_v51 = vrot.slane %v1940_v40, %v2340_v11  ;;  %v1560_v52 = vrot.slane %v1942_v42, %v2340_v11  ;;  %v1583_v54 = vrot.slane %v1569_v43, %v2342_v18  ;;  %v1343_v55 = vrot.slane %v1329_v48, %v2342_v18 }
 0x2b9   : > { %v1184_v56 = vrot.slane %v1176_v45, %v2342_v18  ;;  %v1191_v57 = vrot.slane %v1177_v46, %v2342_v18  ;;  %v1352_v58 = vrot.slane %v1344_v24, %v2342_v18  ;;  %v1359_v47 = vrot.slane %v1345_v27, %v2342_v18 }
 0x2ba   : > { %v1601_v59 = vcombine.high %v1544_v51, %v1560_v52  ;;  %v1937_v60 = vcombine.low %v1336_v44, %v1343_v55  ;;  %v1939_v61 = vcombine.high %v1336_v44, %v1343_v55  ;;  %v1216_v62 = vrot.slane %v1208_v49, %v2342_v18 }
 0x2bb   : > { %v1932_v63 = vcombine.low %v1184_v56, %v1191_v57  ;;  %v1934_v0 = vcombine.high %v1184_v56, %v1191_v57  ;;  %v1941_v1 = vcombine.low %v1352_v58, %v1359_v47  ;;  %v1943_v2 = vcombine.high %v1352_v58, %v1359_v47 }
 0x2bc   : > { %v1615_v41 = vrot.slane %v1601_v59, %v2342_v18  ;;  %v1519_v48 = vrot.slane %v1937_v60, %v2340_v11  ;;  %v1535_v3 = vrot.slane %v1939_v61, %v2340_v11  ;;  %v1223_v4 = vrot.slane %v1209_v50, %v2342_v18 }
 0x2bd   : > { %v1408_v5 = vrot.slane %v1932_v63, %v2340_v11  ;;  %v1424_v8 = vrot.slane %v1934_v0, %v2340_v11  ;;  %v1551_v9 = vrot.slane %v1941_v1, %v2340_v11  ;;  %v1567_v10 = vrot.slane %v1943_v2, %v2340_v11  ;;  %v1711_v1 = vld [vmem:[%s2649_s3] sm:$0xff] }
 0x2be   : > { %v1634_v12 = vcombine.low %v1583_v54, %v1615_v41  ;;  %v1929_v17 = vcombine.low %v2454_v15, %v2465_v26  ;;  %v1584_v19 = vcombine.low %v1519_v48, %v1535_v3  ;;  %v1931_v20 = vcombine.high %v2454_v15, %v2465_v26 }
 0x2bf   : > { %v1464_v13 = vcombine.low %v1408_v5, %v1424_v8  ;;  %v1616_v14 = vcombine.low %v1551_v9, %v1567_v10  ;;  %v1465_v16 = vcombine.high %v1408_v5, %v1424_v8  ;;  %v1933_v21 = vcombine.low %v1216_v62, %v1223_v4 }
 0x2c0   : > { %1652 = vrot.lane.b32.xlu1 %v1634_v12, %s2166_s21  ;;  %v1935_v22 = vcombine.high %v1216_v62, %v1223_v4  ;;  %v2542_v23 = vrot.slane %v1432_v25, %v2342_v18  ;;  %v1433_v27 = vcombine.high %v2448_v6, %v2451_v7  ;;  %v1635_v28 = vcombine.high %v1583_v54, %v1615_v41 }
 0x2c1   : > { %v2545_v24 = vrot.slane %v1464_v13, %v2342_v18  ;;  %v1624_v29 = vrot.slane %v1616_v14, %v2342_v18  ;;  %v1568_v15 = vcombine.low %v2504_v34, %v2507_v35  ;;  %v1600_v26 = vcombine.low %v1544_v51, %v1560_v52 }
 0x2c2   : > { %v1479_v31 = vrot.slane %v1465_v16, %v2342_v18  ;;  %v1415_v25 = vrot.slane %v1933_v21, %v2340_v11  ;;  %v1431_v32 = vrot.slane %v1935_v22, %v2340_v11  ;;  %v1592_v6 = vrot.slane %v1584_v19, %v2342_v18 }
 0x2c3   : > { %v1497_v30 = vcombine.high %v2542_v23, %v2545_v24  ;;  %v1383_v7 = vrot.slane %v1929_v17, %v2340_v11  ;;  %v1399_v33 = vrot.slane %v1931_v20, %v2340_v11  ;;  %v1447_v34 = vrot.slane %v1433_v27, %v2342_v18 }
 0x2c4   : > { %1660 = vrot.lane.b32.xlu1 %v1635_v28, %s2167_s28  ;;  %v1576_v35 = vrot.slane %v1568_v15, %v2342_v18  ;;  %v1608_v36 = vrot.slane %v1600_v26, %v2342_v18  ;;  %v1496_v37 = vcombine.low %v2542_v23, %v2545_v24  ;;  %v1636_v38 = vcombine.low %v1592_v6, %v1624_v29 }
 0x2c5   : > { %1642 = vrot.lane.b32.xlu0 %v1497_v30, %s2168_s6  ;;  %v1617_v39 = vcombine.high %v1551_v9, %v1567_v10  ;;  %v1498_v40 = vcombine.low %v1447_v34, %v1479_v31  ;;  %v1480_v42 = vcombine.low %v1415_v25, %v1431_v32  ;;  %v1585_v44 = vcombine.high %v1519_v48, %v1535_v3 }
 0x2c6   : > { %v1632_v43 = vcombine.low %v1576_v35, %v1608_v36  ;;  %v1448_v11 = vcombine.low %v1383_v7, %v1399_v33  ;;  %v1637_v45 = vcombine.high %v1592_v6, %v1624_v29  ;;  %v1499_v49 = vcombine.high %v1447_v34, %v1479_v31  ;;  %v1710_v31 = vld [vmem:[#allocation6] sm:$0xff] }
 0x2c7   : > { %v1631_v46 = vrot.slane %v1617_v39, %v2342_v18  ;;  %v1488_v50 = vrot.slane %v1480_v42, %v2342_v18  ;;  %v1599_v51 = vrot.slane %v1585_v44, %v2342_v18  ;;  %v1481_v55 = vcombine.high %v1415_v25, %v1431_v32 }
 0x2c8   : > { %1668 = vrot.lane.b32.xlu1 %v1636_v38, %s2164_s25  ;;  %v1456_v52 = vrot.slane %v1448_v11, %v2342_v18  ;;  %v1449_v57 = vcombine.high %v1383_v7, %v1399_v33  ;;  %v1633_v59 = vcombine.high %v1576_v35, %v1608_v36  ;;  %v2173_v61 = vmov 0  }
 0x2c9   : > { %1650 = vrot.lane.b32.xlu0 %v1498_v40, %s2166_s21  ;;  %v1638_v54 = vcombine.low %v1599_v51, %v1631_v46  ;;  %v1639_v58 = vcombine.high %v1599_v51, %v1631_v46  ;;  %v1495_v47 = vrot.slane %v1481_v55, %v2342_v18  ;;  %s2094_s21 = sshll.u32 %s2174_s19, 4  ;;  %s2095_s21 = int_to_ptr.vmem [resolvable:$false] %s2094_s21 }
 0x2ca   : > { %v1500_v56 = vcombine.low %v1456_v52, %v1488_v50  ;;  %v1463_v60 = vrot.slane %v1449_v57, %v2342_v18  ;;  %2035 = vset.pattern.permute.xlu0 %v2173_v61  ;;  %v1501_v63 = vcombine.high %v1456_v52, %v1488_v50  ;;  %s2096_s29 = scalar_lea.vmem %s2095_s21, 256  ;;  %p2097_p1 = scmp.lt.s32.totalorder %s1806_s30, %s2095_s21 }
 0x2cc   : > { %1676 = vrot.lane.b32.xlu1 %v1637_v45, %s2162_s23  ;;  %v1503_v62 = vcombine.high %v1463_v60, %v1495_v47  ;;  %v1502_v0 = vcombine.low %v1463_v60, %v1495_v47 }
 0x2cd   : > { %1658 = vrot.lane.b32.xlu0 %v1499_v49, %s2167_s28 }
 0x2d0   : > { %1684 = vrot.lane.b32.xlu1 %v1638_v54, %s2165_s27 }
 0x2d1   : > { %1666 = vrot.lane.b32.xlu0 %v1500_v56, %s2164_s25  ;;  %s1792_s25 = scalar_lea.sflag [#allocation5], %s2319_s24 }
 0x2d4   : > { %1692 = vrot.lane.b32.xlu1 %v1639_v58, %s2163_s20 }
 0x2d5   : > { %1644 = vrot.lane.b32.xlu0 %v1633_v59, %s2168_s6 }
 0x2d8   : > { %1690 = vrot.lane.b32.xlu1 %v1503_v62, %s2163_s20  ;;  %s2609_s20 = scalar_lea.hbm %s2650_s4, %s1946_s13 }
 0x2d9   : > { %1674 = vrot.lane.b32.xlu0 %v1501_v63, %s2162_s23 }
 0x2dd   : > { %1682 = vrot.lane.b32.xlu0 %v1502_v0, %s2165_s27  ;;  %s2090_s27 = scalar_lea.vmem %s1806_s30, 128 }
 0x2de   : > { %p2091_p9 = scmp.ne.s32.totalorder %s1806_s30, %s2090_s27  ;;  %p2098_p2 = scmp.lt.s32.totalorder %s2096_s29, %s2090_s27 }
 0x2e0   : > { %p2092_p13 = pnand %p2091_p9, %p2667_p11  ;;  %p2099_p0 = por %p2098_p2, %p2097_p1 }
 0x2e1   : > { %1714 = vperm.xlu0 %2035, %v1711_v1  }
 0x2e2   : > { %p2093_p10 = pneg %p2092_p13 }
 0x2e4   : > { %p2100_p3 = pnand %p2099_p0, %p2093_p10 }
 0x332   : > { %v1653_v2 = vpop.permute.xlu1 %1652 }
 0x336   : > { %v1661_v18 = vpop.permute.xlu1 %1660 }
 0x337   : > { %v1643_v41 = vpop.permute.xlu0 %1642 }
 0x338   : > { %v1696_v17 = vsel %vm686_vm1, %v1496_v37, %v1643_v41 }
 0x33a   : > { %v1669_v48 = vpop.permute.xlu1 %1668 }
 0x33b   : > { %v1651_v3 = vpop.permute.xlu0 %1650 }
 0x33c   : > { %v1698_v21 = vsel %vm688_vm2, %v1696_v17, %v1651_v3 }
 0x33e   : > { %v1677_v4 = vpop.permute.xlu1 %1676 }
 0x33f   : > { %v1659_v5 = vpop.permute.xlu0 %1658 }
 0x340   : > { %v1700_v23 = vsel %vm690_vm3, %v1698_v21, %v1659_v5 }
 0x342   : > { %v1685_v9 = vpop.permute.xlu1 %1684 }
 0x343   : > { %v1667_v8 = vpop.permute.xlu0 %1666 }
 0x344   : > { %v1702_v27 = vsel %vm692_vm4, %v1700_v23, %v1667_v8 }
 0x346   : > { %v1693_v14 = vpop.permute.xlu1 %1692 }
 0x347   : > { %v1645_v10 = vpop.permute.xlu0 %1644 }
 0x348   : > { %v1697_v12 = vsel %vm686_vm1, %v1632_v43, %v1645_v10 }
 0x349   : > { %v1699_v13 = vsel %vm688_vm2, %v1697_v12, %v1653_v2 }
 0x34a   : > { %v1701_v16 = vsel %vm690_vm3, %v1699_v13, %v1661_v18  ;;  %v1691_v26 = vpop.permute.xlu1 %1690 }
 0x34b   : > { %v1675_v19 = vpop.permute.xlu0 %1674  ;;  %v1703_v20 = vsel %vm692_vm4, %v1701_v16, %v1669_v48 }
 0x34c   : > { %v1705_v22 = vsel %vm694_vm5, %v1703_v20, %v1677_v4  ;;  %v1704_v29 = vsel %vm694_vm5, %v1702_v27, %v1675_v19 }
 0x34d   : > { %v1707_v24 = vsel %vm696_vm6, %v1705_v22, %v1685_v9 }
 0x34e   : > { %v1709_v28 = vsel %vm698_vm7, %v1707_v24, %v1693_v14 }
 0x34f   : > { %1960 = vmatpush3.msra.mxu1 %v1709_v28  ;;  %v1683_v15 = vpop.permute.xlu0 %1682 }
 0x350   : > { %v1706_v30 = vsel %vm696_vm6, %v1704_v29, %v1683_v15  ;;  %1961 = vmatprep.subr.mxu1 %v2171_v53 }
 0x351   : > { %v1708_v25 = vsel %vm698_vm7, %v1706_v30, %v1691_v26 }
 0x352   : > { %1962 = vmatpush3.msra.mxu1 %v1708_v25 }
 0x353   : > { %1964 = vmatmul.mubr.msk.f32.vlgmr.msra.gmra.mxu1 %vm686_vm1, %v1710_v31 }
 0x35c   : > { %v1715_v32 = vpop.permute.xlu0 %1714 }
 0x413   : > { %v1786_v6 = vpop.f32.mrf.mxu1 }
 0x414   : > { %v1787_v7 = vadd.f32 %v1786_v6, %v1715_v32 }
 0x415   : > { %v1965_v53 = vpop.f32.mrf.mxu1 }
 0x416   : > { %1790 = vst [vmem:[%s225_s14] sm:$0xff] %v1787_v7 }
 0x417   : > { %2103 = shalt.err (!%p2100_p3)
}
 0x418   : > { %s2104_s28 = scalar_lea.hbm %s2609_s20, 128  ;;  %s2108_s7 = scalar_lea.hbm %s2650_s4, 256 }
 0x419   : > { %p2105_p12 = scmp.ne.s32.totalorder %s2609_s20, %s2104_s28  ;;  %p2109_p4 = scmp.lt.s32.totalorder %s2609_s20, %s2650_s4 }
 0x41a   : > { %p2110_p6 = scmp.lt.s32.totalorder %s2108_s7, %s2104_s28 }
 0x41b   : > { %p2106_p5 = pnand %p2105_p12, %p2667_p11 }
 0x41c   : > { %p2111_p8 = por %p2110_p6, %p2109_p4 }
 0x41d   : > { %p2107_p7 = pneg %p2106_p5 }
 0x41f   : > { %p2112_p9 = pnand %p2111_p8, %p2107_p7 }
 0x421   : > { %2115 = shalt.err (!%p2112_p9)
}
 0x422   : > { %1972 = dma.vmem_to_hbm [thread:$0]  (%p2667_p11), %s1806_s30, 128, %s2609_s20, %s1792_s25  }
 0x423 PF: > { %s1817_s10 = sand.u32 1, %s2146_s15   ;;  %p2668_p13 = scmp.ne.s32.totalorder %s2656_s22, 0 }
 0x424   : > { %p2669_p10 = scmp.ge.s32.totalorder %s2158_s18, 2  ;;  %s1818_s13 = scalar_lea.sflag [#allocation5], %s1817_s10 }
 0x426   : > { %p1983_p1 = pnand %p2669_p10, %p2668_p13 }
 0x428   : > { %p1984_p2 = pneg %p1983_p1 }
 0x42a   : > { %2141 = dma.done.wait (%p1984_p2), %s1818_s13, 128  }
 0x42b   : > { %2143 = vsyncadd (%p1984_p2), %s1818_s13, 4294967168  ;;  %p18_p0 = scmp.ge.s32.totalorder %s2248_s26, 4   ;;  %s2670_s15 = smov %s2150_s16 }
 0x42c   : > { %s2671_s16 = smov %s2154_s17  ;;  %s2672_s17 = smov %s2275_s8 }
 0x42d   : > { %s2673_s18 = smov %s2248_s26  ;;  %20 = sbr.rel (!%p18_p0) target bundleno = 6 (0x6), region = 85 }
 0x432   :  { %1823 = vsyncpa [#allocation4], 1 }
 0x433   :  { %1825 = vsyncpa [#allocation4 + $0x1], 1 }
 0x434   :  { %1826 = vsyncpa [#allocation7], 1 }
 0x435   :  { %1827 = vsyncpa [#allocation5], 1 }
 0x436   :  { %1829 = vsyncpa [#allocation5 + $0x1], 1 }

</bundles_post_ra>
